<compile_context>
chip_gen: v7x
topology: tpu7x:2x2x1
jax: 0.10.0
libtpu: 0.0.40
codegen_flags: <defaults>
</compile_context>

<pallas_src>
import jax
import jax.numpy as jnp
from jax.experimental import pallas as pl
from jax.experimental.pallas import tpu as pltpu

HIDDEN = 32
RNN_LAYERS = 2
INPUT_SIZE = 1
OUTPUT_SIZE = 1

# Combined lane-dense output slab layout (per batch tile), f32:
#   rows  0..31 : h1 (layer-0 hidden state), one column per batch element
#   rows 32..63 : h2 (layer-1 hidden state == RNN output)
#   rows 64..71 : y  (output_layer result), replicated over 8 sublanes so the
#                 store is a full 8-sublane x tb-lane unmasked vst
ROW_H1 = 0
ROW_H2 = HIDDEN
ROW_Y = 2 * HIDDEN
OUT_ROWS = 2 * HIDDEN + 8          # 72


# ---------------------------------------------------------------------------
# Kernel
# ---------------------------------------------------------------------------
def neural_pll_batch_kernel(x_ref, w_ih1_ref, w_ih0_ref, b0_ref, b1_ref,
                            w_out8_ref, b_out8_ref, out_ref):
    """TB independent forwards, batch laid out along lanes.

    x_ref      : (1, TB)   inputs (one scalar per batch element)
    w_ih1_ref  : (32, 32)  layer-1 input weights (h2_col = W_ih1 @ h1_col)
    w_ih0_ref  : (32, 1)   layer-0 input weights (column)
    b0_ref     : (32, 1)   b_ih_l0 + b_hh_l0 (pre-folded column)
    b1_ref     : (32, 1)   b_ih_l1 + b_hh_l1 (pre-folded column)
    w_out8_ref : (8, 32)   W_out row replicated over 8 sublanes
    b_out8_ref : (8, 1)    b_out replicated over 8 sublanes
    out_ref    : (72, TB)  combined lane-dense output slab (layout above)

    NOTE: h_prev is identically zero every forward (the PyTorch module calls
    init_hidden() inside forward), so the two h_prev @ W_hh matmuls are dead
    and are NOT computed.  If hidden state were ever carried across calls this
    kernel would be wrong.
    """
    x = x_ref[...]                                               # (1, TB)

    # Layer 0: recurrent term dropped (h_prev == 0) -> VPU broadcast multiply.
    h1 = jnp.tanh(w_ih0_ref[...] * x + b0_ref[...])              # (32, TB)

    # Layer 1: the only contraction worth the MXU; N = TB keeps lanes full.
    h2 = jnp.tanh(
        jnp.dot(w_ih1_ref[...], h1, preferred_element_type=jnp.float32)
        + b1_ref[...])                                           # (32, TB)

    # Output projection on the MXU with M = 8 (W_out replicated) so the result
    # fills a whole sublane tile and the store below is unmasked.
    y8 = (jnp.dot(w_out8_ref[...], h2, preferred_element_type=jnp.float32)
          + b_out8_ref[...])                                     # (8, TB)

    # Three sublane-aligned, full-lane-width (unmasked) stores.
    out_ref[ROW_H1:ROW_H1 + HIDDEN, :] = h1
    out_ref[ROW_H2:ROW_H2 + HIDDEN, :] = h2
    out_ref[ROW_Y:ROW_Y + 8, :] = y8


# ---------------------------------------------------------------------------
# Parameter construction / one-time packing
# ---------------------------------------------------------------------------
def make_params(key):
    """Deterministic init mimicking PyTorch RNN/Linear uniform init."""
    ks = jax.random.split(key, 10)
    bound = 1.0 / jnp.sqrt(jnp.float32(HIDDEN))

    def u(k, shape):
        return jax.random.uniform(k, shape, jnp.float32, -bound, bound)

    return dict(
        w_ih0=u(ks[0], (HIDDEN, INPUT_SIZE)),
        w_hh0=u(ks[1], (HIDDEN, HIDDEN)),     # dead in forward (h_prev == 0)
        b_ih0=u(ks[2], (HIDDEN,)),
        b_hh0=u(ks[3], (HIDDEN,)),
        w_ih1=u(ks[4], (HIDDEN, HIDDEN)),
        w_hh1=u(ks[5], (HIDDEN, HIDDEN)),     # dead in forward (h_prev == 0)
        b_ih1=u(ks[6], (HIDDEN,)),
        b_hh1=u(ks[7], (HIDDEN,)),
        w_out=u(ks[8], (OUTPUT_SIZE, HIDDEN)),
        b_out=u(ks[9], (OUTPUT_SIZE,)),
    )


def pack_params(params):
    """One-time pack into kernel-ready layouts (done at init, not per call).
    Dead W_hh_l0 / W_hh_l1 are not shipped; biases are pre-folded."""
    f32 = jnp.float32
    return dict(
        w_ih1=params["w_ih1"].astype(f32),                                   # (32, 32)
        w_ih0_col=params["w_ih0"].astype(f32).reshape(HIDDEN, 1),            # (32, 1)
        b0_col=(params["b_ih0"] + params["b_hh0"]).astype(f32).reshape(HIDDEN, 1),
        b1_col=(params["b_ih1"] + params["b_hh1"]).astype(f32).reshape(HIDDEN, 1),
        w_out8=jnp.tile(params["w_out"].astype(f32).reshape(1, HIDDEN), (8, 1)),  # (8, 32)
        b_out8=jnp.full((8, 1), params["b_out"][0], f32),                    # (8, 1)
    )


# ---------------------------------------------------------------------------
# Wrappers
# ---------------------------------------------------------------------------
def neural_pll_forward_batch(xb_batch, packed, *, tb=512):
    """B independent forwards (each with freshly zeroed hidden, exactly as the
    PyTorch module does) amortized over one pallas_call.

    tb: batch tile (lanes per grid step), multiple of 128.  Large tiles
    amortize the ~0.35 us per-grid-step overhead; the whole working set is a
    few hundred KB even at tb=4096, far below any generation's VMEM, so size
    tb by step overhead, not memory.  Pick tb <= B/2 on v7x so the 'parallel'
    grid axis (length >= 2) can shard across both TensorCores; on v5e/v6e the
    fewest, largest steps win.
    """
    assert tb % 128 == 0, "tb must be a multiple of the 128-lane tile"
    B = int(xb_batch.shape[0])
    n_tiles = pl.cdiv(B, tb)
    b_pad = n_tiles * tb

    x = jnp.reshape(xb_batch.astype(jnp.float32), (1, B))
    if b_pad != B:
        x = jnp.pad(x, ((0, 0), (0, b_pad - B)))   # padded lanes sliced off below

    const = lambda i: (0, 0)   # weights resident in VMEM: constant index_map
                               # suppresses per-step re-DMA.

    out_slab = pl.pallas_call(
        neural_pll_batch_kernel,
        out_shape=jax.ShapeDtypeStruct((OUT_ROWS, b_pad), jnp.float32),
        grid=(n_tiles,),
        in_specs=[
            pl.BlockSpec((1, tb), lambda i: (0, i)),      # x: lane-dense batch tile
            pl.BlockSpec((HIDDEN, HIDDEN), const),        # W_ih_l1
            pl.BlockSpec((HIDDEN, 1), const),             # W_ih_l0 column
            pl.BlockSpec((HIDDEN, 1), const),             # b0 column
            pl.BlockSpec((HIDDEN, 1), const),             # b1 column
            pl.BlockSpec((8, HIDDEN), const),             # W_out (8x replicated rows)
            pl.BlockSpec((8, 1), const),                  # b_out (8x replicated)
        ],
        out_specs=pl.BlockSpec((OUT_ROWS, tb), lambda i: (0, i)),
        compiler_params=pltpu.CompilerParams(
            dimension_semantics=("parallel",),            # v7x: shard tiles across both TCs
        ),
    )(x, packed["w_ih1"], packed["w_ih0_col"], packed["b0_col"],
      packed["b1_col"], packed["w_out8"], packed["b_out8"])

    h1 = out_slab[ROW_H1:ROW_H1 + HIDDEN, :B]             # (32, B)
    h2 = out_slab[ROW_H2:ROW_H2 + HIDDEN, :B]             # (32, B)
    y = out_slab[ROW_Y:ROW_Y + 1, :B]                     # (1, B)

    out = jnp.transpose(y)                                # (B, 1)
    hidden = jnp.stack([h1.T, h2.T], axis=0)              # (2, B, 32)
    return out, hidden


def neural_pll_forward(xb, packed):
    """Single forward, identical to the PyTorch module's forward(xb):
    returns (out (1, 1), hidden (2, 1, 32)).  Routed through the batched path
    (padded to one 128-lane tile).  Do NOT call this in a host-side loop --
    use neural_pll_forward_batch to amortize launch overhead."""
    x = jnp.reshape(xb, (-1,))
    out, hidden = neural_pll_forward_batch(x, packed, tb=128)
    return out[:1, :], hidden[:, :1, :]


# ---------------------------------------------------------------------------
# Pure-JAX reference (full PyTorch math, including the zero recurrent terms)
# ---------------------------------------------------------------------------
def _reference_forward_batch(xb_batch, params):
    x = jnp.reshape(xb_batch, (-1, 1)).astype(jnp.float32)           # (B, 1)
    h_prev = jnp.zeros((x.shape[0], HIDDEN), jnp.float32)
    h1 = jnp.tanh(x @ params["w_ih0"].T + params["b_ih0"]
                  + h_prev @ params["w_hh0"].T + params["b_hh0"])
    h2 = jnp.tanh(h1 @ params["w_ih1"].T + params["b_ih1"]
                  + h_prev @ params["w_hh1"].T + params["b_hh1"])
    y = h2 @ params["w_out"].T + params["b_out"]
    return y, jnp.stack([h1, h2], axis=0)                            # (B,1), (2,B,32)


if __name__ == "__main__":
    key = jax.random.PRNGKey(0)
    k_param, k_x, k_b = jax.random.split(key, 3)
    params = make_params(k_param)
    packed = pack_params(params)          # one-time pack, done at init

    # --- single forward (exact module semantics) ----------------------------
    xb = jax.random.normal(k_x, (1,), jnp.float32)
    out, hidden = jax.block_until_ready(neural_pll_forward(xb, packed))
    ref_out, ref_hidden = _reference_forward_batch(xb, params)
    assert out.shape == (1, OUTPUT_SIZE)
    assert hidden.shape == (RNN_LAYERS, 1, HIDDEN)
    assert jnp.allclose(out, ref_out, atol=2e-5)
    assert jnp.allclose(hidden, ref_hidden, atol=2e-5)

    # --- batched: many independent forwards per launch ----------------------
    B = 1000                              # non-multiple of tb -> exercises pad-and-slice
    xb_batch = jax.random.normal(k_b, (B,), jnp.float32)
    out_b, hidden_b = jax.block_until_ready(
        neural_pll_forward_batch(xb_batch, packed, tb=512))
    ref_out_b, ref_hidden_b = _reference_forward_batch(xb_batch, params)
    assert out_b.shape == (B, OUTPUT_SIZE)
    assert hidden_b.shape == (RNN_LAYERS, B, HIDDEN)
    assert jnp.allclose(out_b, ref_out_b, atol=2e-5)
    assert jnp.allclose(hidden_b, ref_hidden_b, atol=2e-5)

    # TODO(synk): PLL.forward_VCO / training_step / generate_sin are stateful
    # host-side scalar logic outside forward() and are not implemented as kernels.
    print("KERNEL_OK")
</pallas_src>

<mosaic_0001>
module attributes {stable_mosaic.version = 11 : i64} {
  func.func @neural_pll_batch_kernel(%arg0: i32, %arg1: memref<1x128xf32, #tpu.memory_space<vmem>>, %arg2: memref<32x32xf32, #tpu.memory_space<vmem>>, %arg3: memref<32x1xf32, #tpu.memory_space<vmem>>, %arg4: memref<32x1xf32, #tpu.memory_space<vmem>>, %arg5: memref<32x1xf32, #tpu.memory_space<vmem>>, %arg6: memref<8x32xf32, #tpu.memory_space<vmem>>, %arg7: memref<8x1xf32, #tpu.memory_space<vmem>>, %arg8: memref<72x128xf32, #tpu.memory_space<vmem>>) attributes {dimension_semantics = [#tpu.dimension_semantics<parallel>], iteration_bounds = array<i64: 1>, scalar_prefetch = 0 : i64, scratch_operands = 0 : i64, tpu.core_type = #tpu.core_type<tc>, window_params = [{transform_indices = @transform_0, window_bounds = array<i64: 1, 128>}, {pipeline_mode = #tpu.pipeline_mode<synchronous>, transform_indices = @transform_1, window_bounds = array<i64: 32, 32>}, {pipeline_mode = #tpu.pipeline_mode<synchronous>, transform_indices = @transform_2, window_bounds = array<i64: 32, 1>}, {pipeline_mode = #tpu.pipeline_mode<synchronous>, transform_indices = @transform_3, window_bounds = array<i64: 32, 1>}, {pipeline_mode = #tpu.pipeline_mode<synchronous>, transform_indices = @transform_4, window_bounds = array<i64: 32, 1>}, {pipeline_mode = #tpu.pipeline_mode<synchronous>, transform_indices = @transform_5, window_bounds = array<i64: 8, 32>}, {pipeline_mode = #tpu.pipeline_mode<synchronous>, transform_indices = @transform_6, window_bounds = array<i64: 8, 1>}, {transform_indices = @transform_7, window_bounds = array<i64: 72, 128>}]} {
    %c0 = arith.constant 0 : index
    %c0_0 = arith.constant 0 : index
    %0 = vector.load %arg1[%c0, %c0_0] : memref<1x128xf32, #tpu.memory_space<vmem>>, vector<1x128xf32>
    %c0_1 = arith.constant 0 : index
    %c0_2 = arith.constant 0 : index
    %1 = vector.load %arg3[%c0_1, %c0_2] : memref<32x1xf32, #tpu.memory_space<vmem>>, vector<32x1xf32>
    %2 = vector.broadcast %1 : vector<32x1xf32> to vector<32x128xf32>
    %3 = vector.broadcast %0 : vector<1x128xf32> to vector<32x128xf32>
    %4 = arith.mulf %2, %3 : vector<32x128xf32>
    %c0_3 = arith.constant 0 : index
    %c0_4 = arith.constant 0 : index
    %5 = vector.load %arg4[%c0_3, %c0_4] : memref<32x1xf32, #tpu.memory_space<vmem>>, vector<32x1xf32>
    %6 = vector.broadcast %5 : vector<32x1xf32> to vector<32x128xf32>
    %7 = arith.addf %4, %6 : vector<32x128xf32>
    %8 = math.tanh %7 : vector<32x128xf32>
    %c0_5 = arith.constant 0 : index
    %c0_6 = arith.constant 0 : index
    %9 = vector.load %arg2[%c0_5, %c0_6] : memref<32x32xf32, #tpu.memory_space<vmem>>, vector<32x32xf32>
    %cst = arith.constant dense<0.000000e+00> : vector<32x128xf32>
    %10 = tpu.matmul %9, %8, %cst {dimension_numbers = #tpu.dot_dimension_numbers<[1], [0], [0], [1], [0, 0, 1, 1], [], []>} : vector<32x32xf32>, vector<32x128xf32>, vector<32x128xf32> -> vector<32x128xf32>
    %c0_7 = arith.constant 0 : index
    %c0_8 = arith.constant 0 : index
    %11 = vector.load %arg5[%c0_7, %c0_8] : memref<32x1xf32, #tpu.memory_space<vmem>>, vector<32x1xf32>
    %12 = vector.broadcast %11 : vector<32x1xf32> to vector<32x128xf32>
    %13 = arith.addf %10, %12 : vector<32x128xf32>
    %14 = math.tanh %13 : vector<32x128xf32>
    %c0_9 = arith.constant 0 : index
    %c0_10 = arith.constant 0 : index
    %15 = vector.load %arg6[%c0_9, %c0_10] : memref<8x32xf32, #tpu.memory_space<vmem>>, vector<8x32xf32>
    %cst_11 = arith.constant dense<0.000000e+00> : vector<8x128xf32>
    %16 = tpu.matmul %15, %14, %cst_11 {dimension_numbers = #tpu.dot_dimension_numbers<[1], [0], [0], [1], [0, 0, 1, 1], [], []>} : vector<8x32xf32>, vector<32x128xf32>, vector<8x128xf32> -> vector<8x128xf32>
    %c0_12 = arith.constant 0 : index
    %c0_13 = arith.constant 0 : index
    %17 = vector.load %arg7[%c0_12, %c0_13] : memref<8x1xf32, #tpu.memory_space<vmem>>, vector<8x1xf32>
    %18 = vector.broadcast %17 : vector<8x1xf32> to vector<8x128xf32>
    %19 = arith.addf %16, %18 : vector<8x128xf32>
    %c0_14 = arith.constant 0 : index
    %c0_15 = arith.constant 0 : index
    %20 = vector.load %arg8[%c0_14, %c0_15] : memref<72x128xf32, #tpu.memory_space<vmem>>, vector<32x128xf32>
    tpu.vector_store %arg8[%c0_14, %c0_15], %8 {strides = array<i32>} : memref<72x128xf32, #tpu.memory_space<vmem>>, vector<32x128xf32>,
    %c32 = arith.constant 32 : index
    %c0_16 = arith.constant 0 : index
    %21 = vector.load %arg8[%c32, %c0_16] : memref<72x128xf32, #tpu.memory_space<vmem>>, vector<32x128xf32>
    tpu.vector_store %arg8[%c32, %c0_16], %14 {strides = array<i32>} : memref<72x128xf32, #tpu.memory_space<vmem>>, vector<32x128xf32>,
    %c64 = arith.constant 64 : index
    %c0_17 = arith.constant 0 : index
    %22 = vector.load %arg8[%c64, %c0_17] : memref<72x128xf32, #tpu.memory_space<vmem>>, vector<8x128xf32>
    tpu.vector_store %arg8[%c64, %c0_17], %19 {strides = array<i32>} : memref<72x128xf32, #tpu.memory_space<vmem>>, vector<8x128xf32>,
    return
  }
  func.func @transform_0(%arg0: i32) -> (i32, i32) {
    %c0_i32 = arith.constant 0 : i32
    %c0_i32_0 = arith.constant 0 : i32
    return %c0_i32, %arg0 : i32, i32
  }
  func.func @transform_1(%arg0: i32) -> (i32, i32) {
    %c0_i32 = arith.constant 0 : i32
    %c0_i32_0 = arith.constant 0 : i32
    %c0_i32_1 = arith.constant 0 : i32
    return %c0_i32, %c0_i32_0 : i32, i32
  }
  func.func @transform_2(%arg0: i32) -> (i32, i32) {
    %c0_i32 = arith.constant 0 : i32
    %c0_i32_0 = arith.constant 0 : i32
    %c0_i32_1 = arith.constant 0 : i32
    return %c0_i32, %c0_i32_0 : i32, i32
  }
  func.func @transform_3(%arg0: i32) -> (i32, i32) {
    %c0_i32 = arith.constant 0 : i32
    %c0_i32_0 = arith.constant 0 : i32
    %c0_i32_1 = arith.constant 0 : i32
    return %c0_i32, %c0_i32_0 : i32, i32
  }
  func.func @transform_4(%arg0: i32) -> (i32, i32) {
    %c0_i32 = arith.constant 0 : i32
    %c0_i32_0 = arith.constant 0 : i32
    %c0_i32_1 = arith.constant 0 : i32
    return %c0_i32, %c0_i32_0 : i32, i32
  }
  func.func @transform_5(%arg0: i32) -> (i32, i32) {
    %c0_i32 = arith.constant 0 : i32
    %c0_i32_0 = arith.constant 0 : i32
    %c0_i32_1 = arith.constant 0 : i32
    return %c0_i32, %c0_i32_0 : i32, i32
  }
  func.func @transform_6(%arg0: i32) -> (i32, i32) {
    %c0_i32 = arith.constant 0 : i32
    %c0_i32_0 = arith.constant 0 : i32
    %c0_i32_1 = arith.constant 0 : i32
    return %c0_i32, %c0_i32_0 : i32, i32
  }
  func.func @transform_7(%arg0: i32) -> (i32, i32) {
    %c0_i32 = arith.constant 0 : i32
    %c0_i32_0 = arith.constant 0 : i32
    return %c0_i32, %arg0 : i32, i32
  }
}

</mosaic_0001>

<bundles_post_ra>
// kernel: tpu_custom_call.1
= control target key start
LH: loop header
LB: loop body
LE: loop exit
PB: predicated region body
PF: predicated region fallthrough
CT: control target
= control target key end

     0   :  { %v436_v2 = vmov 0   ;;  %s557_s0 = inlined_call_operand.vmem [shape: f32[1,128], index: 0, kind: input, shape index: {}]   ;;  %s558_s1 = inlined_call_operand.vmem [shape: f32[32,32], index: 1, kind: input, shape index: {}]   ;;  %s559_s2 = inlined_call_operand.vmem [shape: f32[32,1], index: 2, kind: input, shape index: {}]   ;;  %s560_s3 = inlined_call_operand.vmem [shape: f32[32,1], index: 3, kind: input, shape index: {}]   ;;  %s561_s4 = inlined_call_operand.vmem [shape: f32[32,1], index: 4, kind: input, shape index: {}]   ;;  %s562_s5 = inlined_call_operand.vmem [shape: f32[8,32], index: 5, kind: input, shape index: {}]   ;;  %s563_s6 = inlined_call_operand.vmem [shape: f32[8,1], index: 6, kind: input, shape index: {}]   ;;  %s564_s7 = inlined_call_operand.hbm [shape: f32[72,128], index: 7, kind: output, shape index: {}]  }
   0x1   :  { %v62_v0 = vld [vmem:[%s560_s3] sm:$0xff]  ;;  %395 = vset.pattern.permute.xlu1 %v436_v2  ;;  %394 = vset.pattern.permute.xlu0 %v436_v2  ;;  %v63_v3 = vld [vmem:[%s560_s3 + $0x8] sm:$0xff] }
   0x2   :  { %v28_v1 = vld [vmem:[%s559_s2] sm:$0xff]  ;;  %68 = vperm.xlu1 %395, %v62_v0   ;;  %v29_v4 = vld [vmem:[%s559_s2 + $0x8] sm:$0xff] }
   0x3   :  { %34 = vperm.xlu0 %394, %v28_v1  }
   0x4   :  { %12 = vsyncpa [#allocation3], 0  ;;  %v31_v5 = vld [vmem:[%s559_s2 + $0x18] sm:$0xff]  ;;  %v30_v6 = vld [vmem:[%s559_s2 + $0x10] sm:$0xff]  ;;  %vm122_vm0 = vcmask 261120   ;;  %v437_v41 = vmov 0.0|0.0  }
   0x5   :  { %v65_v7 = vld [vmem:[%s560_s3 + $0x18] sm:$0xff]  ;;  %v64_v8 = vld [vmem:[%s560_s3 + $0x10] sm:$0xff]  ;;  %v99_v9 = vld [vmem:[%s561_s4 + $0x8] sm:$0xff]  ;;  %381 = vmatprep.subr.bf16.mxu1 %v437_v41  ;;  %vm438_vm1 = vmmov 0   ;;  %v439_v42 = vmov 0.0   ;;  %s440_s10 = smov [#allocation2]  }
   0x6   :  { %73 = vperm.xlu1 %395, %v63_v3   ;;  %v98_v10 = vld [vmem:[%s561_s4] sm:$0xff]  ;;  %v101_v11 = vld [vmem:[%s561_s4 + $0x18] sm:$0xff]  ;;  %v100_v12 = vld [vmem:[%s561_s4 + $0x10] sm:$0xff]  ;;  %370 = vmatprep.mubr.msk.f32.mxu1 %vm438_vm1, %v439_v42  ;;  %s318_s11 = sshll.u32 %s440_s10, 4  ;;  %s319_s11 = int_to_ptr.vmem [resolvable:$true] %s318_s11 }
   0x7   :  { %39 = vperm.xlu0 %394, %v29_v4   ;;  %v225_v13 = vld [vmem:[%s563_s6] sm:$0xff]  ;;  %v95_v38 = vld [vmem:[%s558_s1 + $0x8] sm:$0xff]  ;;  %v96_v39 = vld [vmem:[%s558_s1 + $0x10] sm:$0xff]  ;;  %s412_s12 = scalar_lea.vmem %s319_s11, 1152  ;;  %p417_p1 = scmp.lt.s32.totalorder %s319_s11, %s319_s11 }
   0x8   :  { %v94_v14 = vld [vmem:[%s558_s1] sm:$0xff]  ;;  %v97_v40 = vld [vmem:[%s558_s1 + $0x18] sm:$0xff]  ;;  %p413_p0 = scmp.ne.s32.totalorder %s319_s11, %s412_s12  ;;  %p418_p2 = scmp.lt.s32.totalorder %s412_s12, %s412_s12 }
   0x9   :  { %356 = vmatprep.mubr.msk.f32.mxu0 %vm122_vm0, %v94_v14  ;;  %v329_v15 = vld [vmem:[%s557_s0] ss:$0 sm:$0xff] }
   0xa   :  { %49 = vperm.xlu1 %395, %v31_v5   ;;  %v224_v61 = vld [vmem:[%s562_s5] sm:$0xff]  ;;  %p419_p3 = por %p418_p2, %p417_p1 }
   0xb   :  { %44 = vperm.xlu0 %394, %v30_v6  }
   0xc   :  { %p420_p4 = pnand %p419_p3, %p413_p0 }
   0xe   :  { %83 = vperm.xlu1 %395, %v65_v7  }
   0xf   :  { %78 = vperm.xlu0 %394, %v64_v8  }
  0x12   :  { %109 = vperm.xlu1 %395, %v99_v9  }
  0x13   :  { %104 = vperm.xlu0 %394, %v98_v10  }
  0x16   :  { %119 = vperm.xlu1 %395, %v101_v11  }
  0x17   :  { %114 = vperm.xlu0 %394, %v100_v12  }
  0x1b   :  { %228 = vperm.xlu0 %394, %v225_v13  }
  0x81   :  { %v69_v16 = vpop.permute.xlu1 %68 }
  0x82   :  { %v35_v17 = vpop.permute.xlu0 %34 }
  0x83   :  { %v58_v18 = vmul.f32 %v329_v15, %v35_v17 }
  0x85   :  { %v86_v19 = vadd.f32 %v69_v16, %v58_v18  ;;  %v74_v20 = vpop.permute.xlu1 %73 }
  0x86   :  { %v40_v21 = vpop.permute.xlu0 %39 }
  0x87   :  { %396 = vtanh.f32 %v86_v19  ;;  %v59_v22 = vmul.f32 %v329_v15, %v40_v21 }
  0x89   :  { %v87_v23 = vadd.f32 %v74_v20, %v59_v22  ;;  %v50_v24 = vpop.permute.xlu1 %49 }
  0x8a   :  { %v45_v25 = vpop.permute.xlu0 %44  ;;  %v61_v26 = vmul.f32 %v329_v15, %v50_v24 }
  0x8b   :  { %398 = vtanh.f32 %v87_v23  ;;  %v60_v27 = vmul.f32 %v329_v15, %v45_v25 }
  0x8d   :  { %v84_v28 = vpop.permute.xlu1 %83 }
  0x8e   :  { %v79_v29 = vpop.permute.xlu0 %78  ;;  %v89_v30 = vadd.f32 %v84_v28, %v61_v26 }
  0x8f   :  { %v88_v31 = vadd.f32 %v79_v29, %v60_v27 }
  0x90   :  { %400 = vtanh.f32 %v89_v30 }
  0x91   :  { %v397_v32 = vpop.eup %396  ;;  %402 = vtanh.f32 %v88_v31  ;;  %v110_v43 = vpop.permute.xlu1 %109 }
  0x92   :  { %304 = vst [vmem:[#allocation2] sm:$0xff] %v397_v32  ;;  %v105_v44 = vpop.permute.xlu0 %104 }
  0x95   :  { %v399_v33 = vpop.eup %398  ;;  %v120_v49 = vpop.permute.xlu1 %119 }
  0x96   :  { %305 = vst [vmem:[#allocation2 + $0x8] sm:$0xff] %v399_v33  ;;  %v373_v34 = vpack.c.bf16 %v399_v33, %v397_v32  ;;  %v115_v51 = vpop.permute.xlu0 %114 }
  0x98   :  { %374 = vmatprep.subr.bf16.mxu0 %v373_v34 }
  0x99   :  { %376 = vmatpush3.bf16.msra.mxu0 %v373_v34 }
  0x9a   :  { %v401_v35 = vpop.eup %400  ;;  %v229_v62 = vpop.permute.xlu0 %228 }
  0x9b   :  { %v403_v36 = vpop.eup %402  ;;  %307 = vst [vmem:[#allocation2 + $0x18] sm:$0xff] %v401_v35 }
  0x9c   :  { %306 = vst [vmem:[#allocation2 + $0x10] sm:$0xff] %v403_v36  ;;  %v377_v37 = vpack.c.bf16 %v401_v35, %v403_v36 }
  0x9e   :  { %378 = vmatprep.subr.bf16.mxu0 %v377_v37 }
  0x9f   :  { %380 = vmatpush3.bf16.msra.mxu0 %v377_v37 }
  0xa2   :  { %357 = vmatmul.mubr.msk.f32.vlgmr.msra.gmra.mrb[0].mxu0 %vm122_vm0, %v95_v38 }
  0xa3   :  { %359 = vmatprep.mubr.msk.f32.mxu0 %vm122_vm0, %v96_v39 }
  0xa6   :  { %360 = vmatmul.mubr.msk.f32.gmra.mrb[2].mxu0 %vm122_vm0, %v97_v40 }
 0x175   :  { %v358_v45 = vpop.f32.mrb[0].mxu0 }
 0x176   :  { %v207_v46 = vadd.f32 %v358_v45, %v110_v43  ;;  %v201_v47 = vpop.f32.mrb[1].mxu0 }
 0x177   :  { %v202_v48 = vadd.f32 %v201_v47, %v105_v44 }
 0x178   :  { %404 = vtanh.f32 %v207_v46 }
 0x179   :  { %406 = vtanh.f32 %v202_v48  ;;  %v361_v50 = vpop.f32.mrb[2].mxu0 }
 0x17a   :  { %v217_v52 = vadd.f32 %v361_v50, %v120_v49  ;;  %v211_v53 = vpop.f32.mrb[3].mxu0 }
 0x17b   :  { %v212_v54 = vadd.f32 %v211_v53, %v115_v51 }
 0x17c   :  { %408 = vtanh.f32 %v217_v52 }
 0x17d   :  { %410 = vtanh.f32 %v212_v54 }
 0x182   :  { %v405_v55 = vpop.eup %404 }
 0x183   :  { %v407_v56 = vpop.eup %406  ;;  %309 = vst [vmem:[#allocation2 + $0x28] sm:$0xff] %v405_v55 }
 0x184   :  { %308 = vst [vmem:[#allocation2 + $0x20] sm:$0xff] %v407_v56  ;;  %v382_v57 = vpack.c.bf16 %v405_v55, %v407_v56 }
 0x186   :  { %v409_v58 = vpop.eup %408  ;;  %383 = vmatpush3.bf16.msra.mxu1 %v382_v57 }
 0x187   :  { %v411_v59 = vpop.eup %410  ;;  %311 = vst [vmem:[#allocation2 + $0x38] sm:$0xff] %v409_v58  ;;  %384 = vmatprep.subr.bf16.mxu1 %v437_v41 }
 0x188   :  { %310 = vst [vmem:[#allocation2 + $0x30] sm:$0xff] %v411_v59  ;;  %v385_v60 = vpack.c.bf16 %v409_v58, %v411_v59 }
 0x18a   :  { %386 = vmatpush3.bf16.msra.mxu1 %v385_v60 }
 0x18d   :  { %371 = vmatmul.mubr.msk.f32.vlgmr.msra.gmra.mrb[0].mxu1 %vm122_vm0, %v224_v61 }
 0x260   :  { %v300_v63 = vpop.f32.mrb[0].mxu1 }
 0x261   :  { %v301_v0 = vadd.f32 %v300_v63, %v229_v62  ;;  %v372_v1 = vpop.f32.mrb[1].mxu1 }
 0x263   :  { %312 = vst [vmem:[#allocation2 + $0x40] sm:$0xff] %v301_v0 }
 0x264   :  { %423 = shalt.err (!%p420_p4)
}
 0x265   :  { %s424_s5 = scalar_lea.hbm %s564_s7, 1152 }
 0x266   :  { %p425_p5 = scmp.ne.s32.totalorder %s564_s7, %s424_s5  ;;  %p428_p6 = scmp.lt.u32.totalorder %s424_s5, %s564_s7 }
 0x268   :  { %p430_p7 = pnand %p428_p6, %p425_p5 }
 0x26a   :  { %433 = shalt.err (!%p430_p7)
}
 0x26b   :  { %s441_s19 = smov 128   ;;  %s442_s20 = smov 8  }
 0x26c   :  { %324 = dma.vmem_to_hbm [thread:$0]  %s319_s11, 1152, %s564_s7, [#allocation3], %s441_s19, %s441_s19, %s442_s20  }
 0x26d   :  { %434 = dma.done.wait [#allocation3], 1152  }
 0x26e   :  { %435 = vsyncadd [#allocation3], 4294966144 }
 0x26f   :  { %328 = vsyncpa [#allocation3], 1 }

</bundles_post_ra>
